<compile_context>
chip_gen: v7x
topology: tpu7x:2x2x1
jax: 0.10.0
libtpu: 0.0.40
codegen_flags: <defaults>
</compile_context>

<pallas_src>
import jax
import jax.numpy as jnp
from jax.experimental import pallas as pl
from jax.experimental.pallas import tpu as pltpu


def _conv_bn_relu_kernel(x_ref, w0_ref, w1_ref, w2_ref, ss_ref, o_ref):
    """Fused 3x3 conv + folded BN(eval) + ReLU for one image.

    x_ref:  (H, W*Cin)       bf16  input rows, channels folded into lanes
    wK_ref: (W*Cin, W*Cout)  bf16  banded weight for kh=K (kw taps + W-padding
                                   folded into the band)
    ss_ref: (2, W*Cout)      f32   row 0 = scale, row 1 = shift (per out lane)
    o_ref:  (H, W*Cout)            output rows (lane-dense)
    """
    H = x_ref.shape[0]
    x = x_ref[...]                                   # bf16, fed to MXU as-is

    # 'same' padding over H: +/-1 row shift on the XLU + boundary-row mask on
    # the VPU.  No scratch buffer, no per-image copies, no zero fill.
    xf = x.astype(jnp.float32)
    row = jax.lax.broadcasted_iota(jnp.int32, xf.shape, 0)
    zero = jnp.zeros_like(xf)
    up = jnp.where(row == 0, zero,
                   pltpu.roll(xf, shift=1, axis=0)).astype(jnp.bfloat16)      # x[h-1]
    down = jnp.where(row == H - 1, zero,
                     pltpu.roll(xf, shift=H - 1, axis=0)).astype(jnp.bfloat16)  # x[h+1]

    # Three MXU matmuls (one per kh tap row), f32 accumulation.
    acc = jnp.dot(x, w1_ref[...], preferred_element_type=jnp.float32)
    acc = acc + jnp.dot(up, w0_ref[...], preferred_element_type=jnp.float32)
    acc = acc + jnp.dot(down, w2_ref[...], preferred_element_type=jnp.float32)

    # Folded conv-bias + BN(eval) as one f32 FMA, ReLU, single cast, then a
    # lane-dense (128-wide) store.
    y = acc * ss_ref[0:1, :] + ss_ref[1:2, :]
    o_ref[...] = jnp.maximum(y, 0.0).astype(o_ref.dtype)


def _kh_bands(w_hwio, W):
    """Per-kh banded weights:
        B_kh[w_in*Cin + ci, w*Cout + co] = w_hwio[kh, w_in - w + 1, ci, co]
    when 0 <= w_in - w + 1 < 3, else 0.  Indexed by *input* column w_in so the
    activation needs no lane offset and no column halo; boundary taps are
    simply absent from the band (== zero padding over W).  Built as a sum of
    Kronecker products (no O(W^2) gather intermediate)."""
    KH, KW, Cin, Cout = w_hwio.shape
    bands = []
    for kh in range(KH):
        b = jnp.zeros((W * Cin, W * Cout), jnp.float32)
        for kw in range(KW):
            # eye[w_in, w] = 1 iff w == w_in + 1 - kw  (i.e. kw = w_in - w + 1)
            eye = jnp.eye(W, W, k=1 - kw, dtype=jnp.float32)
            b = b + jnp.kron(eye, w_hwio[kh, kw].astype(jnp.float32))
        bands.append(b.astype(jnp.bfloat16))
    return bands


@jax.jit
def input_block_nhwc(x_nhwc, w_hwio, scale, shift):
    """Fused Conv2d(3x3, pad=1) + BN(eval) + ReLU.  NHWC in, NHWC out."""
    N, H, W, Cin = x_nhwc.shape
    Cout = w_hwio.shape[-1]
    WC, WO = W * Cin, W * Cout

    b0, b1, b2 = _kh_bands(w_hwio, W)
    x3 = x_nhwc.reshape(N, H, WC).astype(jnp.bfloat16)
    # Per-output-lane scale/shift (lane = w*Cout + co), merged into one operand.
    ss = jnp.stack([jnp.tile(scale, W), jnp.tile(shift, W)]).astype(jnp.float32)

    const2d = lambda n: (0, 0)  # resident across the batch grid (loaded once)
    grid_spec = pltpu.PrefetchScalarGridSpec(
        num_scalar_prefetch=0,
        grid=(N,),
        in_specs=[
            pl.BlockSpec((None, H, WC), lambda n: (n, 0, 0)),   # per-image input
            pl.BlockSpec((WC, WO), const2d),                    # band kh=0
            pl.BlockSpec((WC, WO), const2d),                    # band kh=1
            pl.BlockSpec((WC, WO), const2d),                    # band kh=2
            pl.BlockSpec((2, WO), const2d),                     # scale/shift
        ],
        out_specs=pl.BlockSpec((None, H, WO), lambda n: (n, 0, 0)),
    )
    y3 = pl.pallas_call(
        _conv_bn_relu_kernel,
        out_shape=jax.ShapeDtypeStruct((N, H, WO), x_nhwc.dtype),
        grid_spec=grid_spec,
        compiler_params=pltpu.CompilerParams(
            dimension_semantics=("parallel",)),
    )(x3, b0, b1, b2, ss)
    return y3.reshape(N, H, W, Cout)


def input_block(x_nchw, params):
    """PyTorch-equivalent entry point: NCHW in, NCHW out.

    (If the surrounding network can stay NHWC end-to-end, call
    input_block_nhwc directly; the NCHW<->NHWC transposes here are XLA-side
    HBM round trips kept only for PyTorch-layout parity.)"""
    w_oihw = params["conv_w"]          # (Cout, Cin, 3, 3) -- PyTorch layout
    bias = params["conv_b"]            # (Cout,)
    gamma = params["bn_gamma"]         # (Cout,)
    beta = params["bn_beta"]           # (Cout,)
    mean = params["bn_mean"]           # (Cout,)
    var = params["bn_var"]             # (Cout,)
    eps = params["bn_eps"]

    # Fold conv bias + BN(eval) into per-channel scale/shift.
    scale = gamma / jnp.sqrt(var + eps)
    shift = beta + (bias - mean) * scale

    w_hwio = jnp.transpose(w_oihw, (2, 3, 1, 0))     # OIHW -> HWIO
    x_nhwc = jnp.transpose(x_nchw, (0, 2, 3, 1))     # NCHW -> NHWC

    y_nhwc = input_block_nhwc(x_nhwc, w_hwio, scale, shift)
    return jnp.transpose(y_nhwc, (0, 3, 1, 2))       # NHWC -> NCHW


def _reference(x_nchw, params):
    """Pure-JAX reference (lax conv) for correctness checking."""
    y = jax.lax.conv_general_dilated(
        x_nchw, params["conv_w"], window_strides=(1, 1), padding="SAME",
        dimension_numbers=("NCHW", "OIHW", "NCHW"))
    y = y + params["conv_b"][None, :, None, None]
    scale = params["bn_gamma"] / jnp.sqrt(params["bn_var"] + params["bn_eps"])
    shift = params["bn_beta"] - params["bn_mean"] * scale
    y = y * scale[None, :, None, None] + shift[None, :, None, None]
    return jnp.maximum(y, 0.0)


if __name__ == "__main__":
    # Small shapes consistent with the module: batch=2, in_channels=4,
    # out_channels=8, spatial=16x16 (input is NCHW like PyTorch).
    N, Cin, Cout, H, W = 2, 4, 8, 16, 16

    key = jax.random.PRNGKey(0)
    kx, kw, kb, kg, kbeta = jax.random.split(key, 5)

    x = jax.random.normal(kx, (N, Cin, H, W), dtype=jnp.float32)

    params = {
        "conv_w": jax.random.normal(kw, (Cout, Cin, 3, 3), jnp.float32) * 0.1,
        "conv_b": jax.random.normal(kb, (Cout,), jnp.float32) * 0.1,
        "bn_gamma": 1.0 + 0.1 * jax.random.normal(kg, (Cout,), jnp.float32),
        "bn_beta": 0.1 * jax.random.normal(kbeta, (Cout,), jnp.float32),
        "bn_mean": jnp.zeros((Cout,), jnp.float32),   # fresh module running stats
        "bn_var": jnp.ones((Cout,), jnp.float32),
        "bn_eps": 1e-5,
    }

    out = input_block(x, params)
    out = jax.block_until_ready(out)

    ref = _reference(x, params)
    assert out.shape == (N, Cout, H, W), out.shape
    # bf16 MXU operands (f32 accumulation) -> tolerance loosened vs f32.
    max_err = float(jnp.max(jnp.abs(out - ref)))
    assert jnp.allclose(out, ref, atol=3e-2, rtol=3e-2), max_err

    print("KERNEL_OK")
</pallas_src>

<mosaic_0001>
module attributes {stable_mosaic.version = 11 : i64} {
  func.func @_conv_bn_relu_kernel(%arg0: i32, %arg1: memref<1x16x64xbf16, #tpu.memory_space<vmem>>, %arg2: memref<64x128xbf16, #tpu.memory_space<vmem>>, %arg3: memref<64x128xbf16, #tpu.memory_space<vmem>>, %arg4: memref<64x128xbf16, #tpu.memory_space<vmem>>, %arg5: memref<2x128xf32, #tpu.memory_space<vmem>>, %arg6: memref<1x16x128xf32, #tpu.memory_space<vmem>>) attributes {dimension_semantics = [#tpu.dimension_semantics<parallel>], iteration_bounds = array<i64: 2>, scalar_prefetch = 0 : i64, scratch_operands = 0 : i64, tpu.core_type = #tpu.core_type<tc>, window_params = [{transform_indices = @transform_0, window_bounds = array<i64: 1, 16, 64>}, {pipeline_mode = #tpu.pipeline_mode<synchronous>, transform_indices = @transform_1, window_bounds = array<i64: 64, 128>}, {pipeline_mode = #tpu.pipeline_mode<synchronous>, transform_indices = @transform_2, window_bounds = array<i64: 64, 128>}, {pipeline_mode = #tpu.pipeline_mode<synchronous>, transform_indices = @transform_3, window_bounds = array<i64: 64, 128>}, {pipeline_mode = #tpu.pipeline_mode<synchronous>, transform_indices = @transform_4, window_bounds = array<i64: 2, 128>}, {transform_indices = @transform_5, window_bounds = array<i64: 1, 16, 128>}]} {
    %c0 = arith.constant 0 : index
    %c0_0 = arith.constant 0 : index
    %c0_1 = arith.constant 0 : index
    %0 = vector.load %arg1[%c0, %c0_0, %c0_1] : memref<1x16x64xbf16, #tpu.memory_space<vmem>>, vector<1x16x64xbf16>
    %1 = vector.shape_cast %0 : vector<1x16x64xbf16> to vector<16x64xbf16>
    %2 = arith.extf %1 : vector<16x64xbf16> to vector<16x64xf32>
    %3 = tpu.iota {dimensions = array<i32: 0>} : vector<16x64xi32>
    %cst = arith.constant 0.000000e+00 : f32
    %4 = vector.broadcast %cst : f32 to vector<16x64xf32>
    %c0_i32 = arith.constant 0 : i32
    %5 = vector.broadcast %c0_i32 : i32 to vector<16x64xi32>
    %6 = arith.cmpi eq, %3, %5 : vector<16x64xi32>
    %c1_i32 = arith.constant 1 : i32
    %7 = tpu.dynamic_rotate %2 by %c1_i32 dim 0 : vector<16x64xf32>, i32 -> vector<16x64xf32>
    %8 = arith.select %6, %4, %7 : vector<16x64xi1>, vector<16x64xf32>
    %9 = arith.truncf %8 : vector<16x64xf32> to vector<16x64xbf16>
    %c15_i32 = arith.constant 15 : i32
    %10 = vector.broadcast %c15_i32 : i32 to vector<16x64xi32>
    %11 = arith.cmpi eq, %3, %10 : vector<16x64xi32>
    %c15_i32_2 = arith.constant 15 : i32
    %12 = tpu.dynamic_rotate %2 by %c15_i32_2 dim 0 : vector<16x64xf32>, i32 -> vector<16x64xf32>
    %13 = arith.select %11, %4, %12 : vector<16x64xi1>, vector<16x64xf32>
    %14 = arith.truncf %13 : vector<16x64xf32> to vector<16x64xbf16>
    %c0_3 = arith.constant 0 : index
    %c0_4 = arith.constant 0 : index
    %15 = vector.load %arg3[%c0_3, %c0_4] : memref<64x128xbf16, #tpu.memory_space<vmem>>, vector<64x128xbf16>
    %cst_5 = arith.constant dense<0.000000e+00> : vector<16x128xf32>
    %16 = tpu.matmul %1, %15, %cst_5 {dimension_numbers = #tpu.dot_dimension_numbers<[1], [0], [0], [1], [0, 0, 1, 1], [], []>} : vector<16x64xbf16>, vector<64x128xbf16>, vector<16x128xf32> -> vector<16x128xf32>
    %c0_6 = arith.constant 0 : index
    %c0_7 = arith.constant 0 : index
    %17 = vector.load %arg2[%c0_6, %c0_7] : memref<64x128xbf16, #tpu.memory_space<vmem>>, vector<64x128xbf16>
    %cst_8 = arith.constant dense<0.000000e+00> : vector<16x128xf32>
    %18 = tpu.matmul %9, %17, %cst_8 {dimension_numbers = #tpu.dot_dimension_numbers<[1], [0], [0], [1], [0, 0, 1, 1], [], []>} : vector<16x64xbf16>, vector<64x128xbf16>, vector<16x128xf32> -> vector<16x128xf32>
    %19 = arith.addf %16, %18 : vector<16x128xf32>
    %c0_9 = arith.constant 0 : index
    %c0_10 = arith.constant 0 : index
    %20 = vector.load %arg4[%c0_9, %c0_10] : memref<64x128xbf16, #tpu.memory_space<vmem>>, vector<64x128xbf16>
    %cst_11 = arith.constant dense<0.000000e+00> : vector<16x128xf32>
    %21 = tpu.matmul %14, %20, %cst_11 {dimension_numbers = #tpu.dot_dimension_numbers<[1], [0], [0], [1], [0, 0, 1, 1], [], []>} : vector<16x64xbf16>, vector<64x128xbf16>, vector<16x128xf32> -> vector<16x128xf32>
    %22 = arith.addf %19, %21 : vector<16x128xf32>
    %c0_12 = arith.constant 0 : index
    %c0_13 = arith.constant 0 : index
    %23 = vector.load %arg5[%c0_12, %c0_13] : memref<2x128xf32, #tpu.memory_space<vmem>>, vector<1x128xf32>
    %24 = vector.broadcast %23 : vector<1x128xf32> to vector<16x128xf32>
    %25 = arith.mulf %22, %24 : vector<16x128xf32>
    %c1 = arith.constant 1 : index
    %c0_14 = arith.constant 0 : index
    %26 = vector.load %arg5[%c1, %c0_14] : memref<2x128xf32, #tpu.memory_space<vmem>>, vector<1x128xf32>
    %27 = vector.broadcast %26 : vector<1x128xf32> to vector<16x128xf32>
    %28 = arith.addf %25, %27 : vector<16x128xf32>
    %cst_15 = arith.constant 0.000000e+00 : f32
    %29 = vector.broadcast %cst_15 : f32 to vector<16x128xf32>
    %30 = arith.maximumf %28, %29 : vector<16x128xf32>
    %c0_16 = arith.constant 0 : index
    %c0_17 = arith.constant 0 : index
    %c0_18 = arith.constant 0 : index
    %31 = vector.load %arg6[%c0_16, %c0_17, %c0_18] : memref<1x16x128xf32, #tpu.memory_space<vmem>>, vector<1x16x128xf32>
    %32 = vector.shape_cast %31 : vector<1x16x128xf32> to vector<16x128xf32>
    %33 = vector.shape_cast %30 : vector<16x128xf32> to vector<1x16x128xf32>
    tpu.vector_store %arg6[%c0_16, %c0_17, %c0_18], %33 {strides = array<i32>} : memref<1x16x128xf32, #tpu.memory_space<vmem>>, vector<1x16x128xf32>,
    return
  }
  func.func @transform_0(%arg0: i32) -> (i32, i32, i32) {
    %c0_i32 = arith.constant 0 : i32
    %c0_i32_0 = arith.constant 0 : i32
    %c0_i32_1 = arith.constant 0 : i32
    return %arg0, %c0_i32, %c0_i32_0 : i32, i32, i32
  }
  func.func @transform_1(%arg0: i32) -> (i32, i32) {
    %c0_i32 = arith.constant 0 : i32
    %c0_i32_0 = arith.constant 0 : i32
    %c0_i32_1 = arith.constant 0 : i32
    return %c0_i32, %c0_i32_0 : i32, i32
  }
  func.func @transform_2(%arg0: i32) -> (i32, i32) {
    %c0_i32 = arith.constant 0 : i32
    %c0_i32_0 = arith.constant 0 : i32
    %c0_i32_1 = arith.constant 0 : i32
    return %c0_i32, %c0_i32_0 : i32, i32
  }
  func.func @transform_3(%arg0: i32) -> (i32, i32) {
    %c0_i32 = arith.constant 0 : i32
    %c0_i32_0 = arith.constant 0 : i32
    %c0_i32_1 = arith.constant 0 : i32
    return %c0_i32, %c0_i32_0 : i32, i32
  }
  func.func @transform_4(%arg0: i32) -> (i32, i32) {
    %c0_i32 = arith.constant 0 : i32
    %c0_i32_0 = arith.constant 0 : i32
    %c0_i32_1 = arith.constant 0 : i32
    return %c0_i32, %c0_i32_0 : i32, i32
  }
  func.func @transform_5(%arg0: i32) -> (i32, i32, i32) {
    %c0_i32 = arith.constant 0 : i32
    %c0_i32_0 = arith.constant 0 : i32
    %c0_i32_1 = arith.constant 0 : i32
    return %arg0, %c0_i32, %c0_i32_0 : i32, i32, i32
  }
}

</mosaic_0001>

<bundles_post_ra>
// kernel: tile.13
= control target key start
LH: loop header
LB: loop body
LE: loop exit
PB: predicated region body
PF: predicated region fallthrough
CT: control target
= control target key end

     0   :  { %s28_s0 = inlined_call_operand.vmem [shape: f32[8], index: 0, kind: input, shape index: {}]   ;;  %s29_s1 = inlined_call_operand.vmem [shape: f32[16,8], index: 1, kind: output, shape index: {}]  }
   0x1   :  { %v4_v0 = vld [vmem:[%s28_s0] ss:$0 sm:$0xff] }
   0x2   :  { %5 = vst [vmem:[%s29_s1] sm:$0xff] %v4_v0  ;;  %8 = vst [vmem:[%s29_s1 + $0x8] sm:$0xff] %v4_v0 }

// kernel: tile.18
= control target key start
LH: loop header
LB: loop body
LE: loop exit
PB: predicated region body
PF: predicated region fallthrough
CT: control target
= control target key end

     0   :  { %s131_s10 = smov 120   ;;  %s132_s11 = smov 104   ;;  %vm3_vm0 = vcmask 64512   ;;  %vm9_vm1 = vcmask 1048512   ;;  %vm15_vm2 = vcmask 982912   ;;  %vm21_vm3 = vcmask 917312   ;;  %s207_s0 = inlined_call_operand.vmem [shape: f32[16,8], index: 0, kind: input, shape index: {}]   ;;  %s208_s1 = inlined_call_operand.vmem [shape: f32[1,128], index: 1, kind: output, shape index: {}]  }
   0x1   :  { %v101_v0 = vld [vmem:[%s207_s0 + $0xf] sm:$0x1]   ;;  %v103_v1 = vld [vmem:[%s207_s0 + $0xd] sm:$0x1]   ;;  %v102_v2 = vld [vmem:[%s207_s0 + $0xe] sm:$0x1]  }
   0x2   :  { %7 = vrot.lane.b32.xlu0 %v101_v0, %s131_s10  ;;  %19 = vrot.lane.b32.xlu1 %v103_v1, %s132_s11  ;;  %v104_v3 = vld [vmem:[%s207_s0 + $0xc] sm:$0x1]   ;;  %s133_s16 = smov 112   ;;  %s134_s17 = smov 96   ;;  %v105_v4 = vld [vmem:[%s207_s0 + $0xb] sm:$0x1]  }
   0x3   :  { %v106_v5 = vld [vmem:[%s207_s0 + $0xa] sm:$0x1]   ;;  %v2_v6 = vld [vmem:[%s207_s0] sm:$0x1]   ;;  %s135_s24 = smov 88   ;;  %s136_s25 = smov 80  }
   0x4   :  { %4 = vst.msk [vmem:[#allocation0] sm:$0x1] %vm3_vm0, %v2_v6   ;;  %v107_v7 = vld [vmem:[%s207_s0 + $0x9] sm:$0x1]   ;;  %v108_v8 = vld [vmem:[%s207_s0 + $0x8] sm:$0x1]  }
   0x5   :  { %s137_s30 = smov 72   ;;  %s138_s2 = smov 64   ;;  %v109_v9 = vld [vmem:[%s207_s0 + $0x7] sm:$0x1]   ;;  %v110_v10 = vld [vmem:[%s207_s0 + $0x6] sm:$0x1]  }
   0x6   :  { %13 = vrot.lane.b32.xlu0 %v102_v2, %s133_s16  ;;  %25 = vrot.lane.b32.xlu1 %v104_v3, %s134_s17  ;;  %s139_s7 = smov 56   ;;  %s140_s8 = smov 48   ;;  %v111_v11 = vld [vmem:[%s207_s0 + $0x5] sm:$0x1]   ;;  %v112_v12 = vld [vmem:[%s207_s0 + $0x4] sm:$0x1]  }
   0x7   :  { %s141_s13 = smov 40   ;;  %s142_s14 = smov 32   ;;  %v113_v13 = vld [vmem:[%s207_s0 + $0x3] sm:$0x1]   ;;  %v114_v14 = vld [vmem:[%s207_s0 + $0x2] sm:$0x1]  }
   0x8   :  { %s143_s19 = smov 24   ;;  %s144_s20 = smov 16   ;;  %v115_v15 = vld [vmem:[%s207_s0 + $0x1] sm:$0x1]   ;;  %vm27_vm4 = vcmask 851712   ;;  %vm33_vm5 = vcmask 786112  }
   0x9   :  { %s145_s0 = smov 8   ;;  %vm39_vm6 = vcmask 720512   ;;  %vm45_vm7 = vcmask 654912   ;;  %vm51_vm8 = vcmask 589312   ;;  %vm57_vm9 = vcmask 523712  }
   0xa   :  { %31 = vrot.lane.b32.xlu0 %v105_v4, %s135_s24  ;;  %37 = vrot.lane.b32.xlu1 %v106_v5, %s136_s25  ;;  %vm63_vm10 = vcmask 458112   ;;  %vm69_vm11 = vcmask 392512   ;;  %vm75_vm12 = vcmask 326912   ;;  %vm81_vm13 = vcmask 261312  }
   0xb   :  { %vm87_vm14 = vcmask 195712   ;;  %vm93_vm15 = vcmask 130112  }
   0xe   :  { %43 = vrot.lane.b32.xlu0 %v107_v7, %s137_s30  ;;  %49 = vrot.lane.b32.xlu1 %v108_v8, %s138_s2 }
  0x12   :  { %55 = vrot.lane.b32.xlu0 %v109_v9, %s139_s7  ;;  %61 = vrot.lane.b32.xlu1 %v110_v10, %s140_s8 }
  0x16   :  { %67 = vrot.lane.b32.xlu0 %v111_v11, %s141_s13  ;;  %73 = vrot.lane.b32.xlu1 %v112_v12, %s142_s14 }
  0x1a   :  { %79 = vrot.lane.b32.xlu0 %v113_v13, %s143_s19  ;;  %85 = vrot.lane.b32.xlu1 %v114_v14, %s144_s20 }
  0x1e   :  { %91 = vrot.lane.b32.xlu0 %v115_v15, %s145_s0 }
  0x74   :  { %v8_v16 = vpop.permute.xlu0 %7   ;;  %v20_v17 = vpop.permute.xlu1 %19  }
  0x75   :  { %10 = vst.msk [vmem:[#allocation0] sm:$0x1] %vm9_vm1, %v8_v16  }
  0x78   :  { %v14_v18 = vpop.permute.xlu0 %13   ;;  %v26_v19 = vpop.permute.xlu1 %25  }
  0x79   :  { %16 = vst.msk [vmem:[#allocation0] sm:$0x1] %vm15_vm2, %v14_v18  }
  0x7a   :  { %22 = vst.msk [vmem:[#allocation0] sm:$0x1] %vm21_vm3, %v20_v17  }
  0x7b   :  { %28 = vst.msk [vmem:[#allocation0] sm:$0x1] %vm27_vm4, %v26_v19  }
  0x7c   :  { %v32_v20 = vpop.permute.xlu0 %31   ;;  %v38_v21 = vpop.permute.xlu1 %37  }
  0x7d   :  { %34 = vst.msk [vmem:[#allocation0] sm:$0x1] %vm33_vm5, %v32_v20  }
  0x7e   :  { %40 = vst.msk [vmem:[#allocation0] sm:$0x1] %vm39_vm6, %v38_v21  }
  0x80   :  { %v44_v22 = vpop.permute.xlu0 %43   ;;  %v50_v23 = vpop.permute.xlu1 %49  }
  0x81   :  { %46 = vst.msk [vmem:[#allocation0] sm:$0x1] %vm45_vm7, %v44_v22  }
  0x82   :  { %52 = vst.msk [vmem:[#allocation0] sm:$0x1] %vm51_vm8, %v50_v23  }
  0x84   :  { %v56_v24 = vpop.permute.xlu0 %55   ;;  %v62_v25 = vpop.permute.xlu1 %61  }
  0x85   :  { %58 = vst.msk [vmem:[#allocation0] sm:$0x1] %vm57_vm9, %v56_v24  }
  0x86   :  { %64 = vst.msk [vmem:[#allocation0] sm:$0x1] %vm63_vm10, %v62_v25  }
  0x88   :  { %v68_v26 = vpop.permute.xlu0 %67   ;;  %v74_v27 = vpop.permute.xlu1 %73  }
  0x89   :  { %70 = vst.msk [vmem:[#allocation0] sm:$0x1] %vm69_vm11, %v68_v26  }
  0x8a   :  { %76 = vst.msk [vmem:[#allocation0] sm:$0x1] %vm75_vm12, %v74_v27  }
  0x8c   :  { %v80_v28 = vpop.permute.xlu0 %79   ;;  %v86_v29 = vpop.permute.xlu1 %85  }
  0x8d   :  { %82 = vst.msk [vmem:[#allocation0] sm:$0x1] %vm81_vm13, %v80_v28  }
  0x8e   :  { %88 = vst.msk [vmem:[#allocation0] sm:$0x1] %vm87_vm14, %v86_v29  }
  0x90   :  { %v92_v30 = vpop.permute.xlu0 %91  }
  0x91   :  { %94 = vst.msk [vmem:[#allocation0] sm:$0x1] %vm93_vm15, %v92_v30  }
  0x98   :  { %v98_v31 = vld [vmem:[#allocation0] sm:$0x1] }
  0x99   :  { %100 = vst [vmem:[%s208_s1] sm:$0x1] %v98_v31 }

// kernel: input_block_nhwc.1
= control target key start
LH: loop header
LB: loop body
LE: loop exit
PB: predicated region body
PF: predicated region fallthrough
CT: control target
= control target key end

     0   :  { %s714_s18 = smov 0   ;;  %s798_s0 = inlined_call_operand.vmem [shape: bf16[2,16,64], index: 0, kind: input, shape index: {}]   ;;  %s799_s1 = inlined_call_operand.vmem [shape: bf16[64,128], index: 1, kind: input, shape index: {}]   ;;  %s800_s2 = inlined_call_operand.vmem [shape: bf16[64,128], index: 2, kind: input, shape index: {}]   ;;  %s801_s3 = inlined_call_operand.vmem [shape: bf16[64,128], index: 3, kind: input, shape index: {}]   ;;  %s802_s4 = inlined_call_operand.vmem [shape: f32[2,128], index: 4, kind: input, shape index: {}]   ;;  %s803_s5 = inlined_call_operand.vmem [shape: f32[2,16,128], index: 5, kind: output, shape index: {}]  }
   0x1 LB: > { %s562_s19 = sadd.s32 4294967295, %s680_s18   ;;  %p566_p0 = scmp.ge.s32.totalorder %s680_s18, 1  ;;  %s680_s18 = sphi %s714_s18, %s15_s18  }
   0x2   : > { %p187_p1 = scmp.lt.s32.totalorder %s680_s18, 3 }
   0x4   : > { %p188_p2 = pnand %p566_p0, %p187_p1 }
   0x5   : > { %v660_v0 = vld [vmem:[%s800_s2] sm:$0xff] (!%p188_p2)   ;;  %v682_v1 = vmov (!%p188_p2), 0.0   ;;  %v230_v2 = vlaneseq (!%p188_p2)  ;;  %v661_v3 = vld [vmem:[%s800_s2 + $0x8] sm:$0xff] (!%p188_p2)   ;;  %vm683_vm0 = vmmov (!%p188_p2), 0   ;;  %p215_p3 = scmp.lt.s32.totalorder (!%p188_p2), %s562_s19, 1  ;;  %v662_v5 = vld [vmem:[%s800_s2 + $0x10] sm:$0xff] (!%p188_p2)  }
   0x6   : > { %191 = sbr.rel (%p188_p2) target bundleno = 261 (0x105), region = 40  ;;  %620 = vmatprep.subr.bf16.mxu0 (!%p188_p2), %v682_v1  ;;  %608 = vmatprep.subr.bf16.mxu1 (!%p188_p2), %v682_v1  ;;  %v664_v4 = vld [vmem:[%s799_s1] sm:$0xff] (!%p188_p2)   ;;  %v667_v7 = vld [vmem:[%s799_s1 + $0x8] sm:$0xff] (!%p188_p2)   ;;  %v663_v9 = vld [vmem:[%s800_s2 + $0x18] sm:$0xff] (!%p188_p2)   ;;  %vm293_vm3 = vcmask (!%p188_p2), 523264  }
   0x7   : > { %621 = vmatpush3.bf16.msra.mxu0 (!%p188_p2), %v660_v0  ;;  %628 = vmatprep.mubr.msk.bf16.mxu0 (!%p188_p2), %vm683_vm0, %v682_v1  ;;  %v231_v6 = vshrl.u32 (!%p188_p2), %v230_v2, 7  ;;  %v669_v12 = vld [vmem:[%s799_s1 + $0x10] sm:$0xff] (!%p188_p2)   ;;  %v666_v16 = vld [vmem:[%s801_s3] sm:$0xff] (!%p188_p2)   ;;  %v671_v17 = vld [vmem:[%s799_s1 + $0x18] sm:$0xff] (!%p188_p2)  }
   0x8   : > { %622 = vmatprep.subr.bf16.mxu0 (!%p188_p2), %v682_v1  ;;  %616 = vmatprep.mubr.msk.bf16.mxu1 (!%p188_p2), %vm683_vm0, %v682_v1  ;;  %v668_v21 = vld [vmem:[%s801_s3 + $0x8] sm:$0xff] (!%p188_p2)   ;;  %v670_v25 = vld [vmem:[%s801_s3 + $0x10] sm:$0xff] (!%p188_p2)   ;;  %v672_v27 = vld [vmem:[%s801_s3 + $0x18] sm:$0xff] (!%p188_p2)  }
   0x9   : > { %609 = vmatpush3.bf16.msra.mxu1 (!%p188_p2), %v664_v4  ;;  %vm237_vm1 = vcmp.lt.s32.totalorder (!%p188_p2), %v231_v6, 1  ;;  %vm233_vm2 = vcmp.eq.s32.totalorder (!%p188_p2), %v231_v6, 0  ;;  %v232_v24 = vadd.s32 (!%p188_p2), 8, %v231_v6  ;;  %vm247_vm4 = vcmp.lt.s32.totalorder (!%p188_p2), %v231_v6, 7  ;;  %v587_v36 = vld [vmem:[%s802_s4] ss:$0 sm:$0xff] (!%p188_p2) }
   0xa   : > { %610 = vmatprep.subr.bf16.mxu1 (!%p188_p2), %v682_v1  ;;  %v588_v39 = vld [vmem:[%s802_s4 + $0x1] ss:$0 sm:$0xff] (!%p188_p2) }
   0xb   : > { %623 = vmatpush3.bf16.msra.mxu0 (!%p188_p2), %v661_v3  ;;  %vm244_vm5 = vcmp.eq.s32.totalorder (!%p188_p2), %v232_v24, 15 }
   0xc   : > { %624 = vmatprep.subr.bf16.mxu0 (!%p188_p2), %v682_v1 }
   0xd   : > { %s805_s19 = smov (!%p215_p3, %s562_s19), 1  ;;  %611 = vmatpush3.bf16.msra.mxu1 %v667_v7 }
   0xe   : > { %s591_s28 = sshll.u32 %s805_s19, 3  ;;  %612 = vmatprep.subr.bf16.mxu1 %v682_v1  ;;  %s592_s29 = sshll.u32 %s805_s19, 4 }
   0xf   : > { %s219_s8 = scalar_lea.vmem %s798_s0, %s591_s28  ;;  %625 = vmatpush3.bf16.msra.mxu0 %v662_v5  ;;  %s224_s7 = scalar_lea.vmem %s803_s5, %s592_s29 }
  0x10   : > { %v226_v8 = vld [vmem:[%s219_s8] sm:$0xff]   ;;  %626 = vmatprep.subr.bf16.mxu0 %v682_v1 }
  0x11   : > { %v228_v10 = vunpack.c.l.bf16 %v226_v8  ;;  %v229_v11 = vunpack.c.h.bf16 %v226_v8  ;;  %613 = vmatpush3.bf16.msra.mxu1 %v669_v12 }
  0x12   : > { %614 = vmatprep.subr.bf16.mxu1 %v682_v1 }
  0x13   : > { %v235_v13 = vrot.slane %v228_v10, 7  ;;  %v236_v14 = vrot.slane %v229_v11, 7  ;;  %627 = vmatpush3.bf16.msra.mxu0 %v663_v9  ;;  %v245_v22 = vrot.slane %v228_v10, 1  ;;  %v246_v23 = vrot.slane %v229_v11, 1 }
  0x14   : > { %632 = vmatprep.subr.bf16.mxu0 %v682_v1 }
  0x15   : > { %v239_v15 = vsel %vm237_vm1, %v236_v14, %v235_v13  ;;  %v238_v18 = vsel %vm237_vm1, %v235_v13, %v236_v14  ;;  %615 = vmatpush3.bf16.msra.mxu1 %v671_v17  ;;  %v249_v26 = vsel %vm247_vm4, %v246_v23, %v245_v22  ;;  %v248_v28 = vsel %vm247_vm4, %v245_v22, %v246_v23 }
  0x16   : > { %v240_v19 = vsel %vm233_vm2, 0.0, %v239_v15  ;;  %629 = vmatmul.mubr.msk.bf16.vlgmr.msra.gmra.mrb[0].mxu0 %vm293_vm3, %v226_v8  ;;  %v251_v29 = vsel %vm244_vm5, 0.0, %v249_v26 }
  0x17   : > { %v242_v20 = vpack.c.bf16 %v238_v18, %v240_v19  ;;  %633 = vmatpush3.bf16.msra.mxu0 %v666_v16  ;;  %640 = vmatprep.mubr.msk.bf16.mxu0 %vm683_vm0, %v682_v1  ;;  %v252_v30 = vpack.c.bf16 %v251_v29, %v248_v28 }
  0x18   : > { %634 = vmatprep.subr.bf16.mxu0 %v682_v1 }
  0x19   : > { %617 = vmatmul.mubr.msk.bf16.vlgmr.msra.gmra.mrb[0].mxu1 %vm293_vm3, %v242_v20 }
  0x1b   : > { %635 = vmatpush3.bf16.msra.mxu0 %v668_v21 }
  0x1c   : > { %636 = vmatprep.subr.bf16.mxu0 %v682_v1 }
  0x1f   : > { %637 = vmatpush3.bf16.msra.mxu0 %v670_v25 }
  0x20   : > { %638 = vmatprep.subr.bf16.mxu0 %v682_v1 }
  0x23   : > { %639 = vmatpush3.bf16.msra.mxu0 %v672_v27 }
  0x26   : > { %641 = vmatmul.mubr.msk.bf16.vlgmr.msra.gmra.mrb[0].mxu0 %vm293_vm3, %v252_v30 }
  0xec   : > { %v331_v31 = vpop.f32.mrb[0].mxu1 }
  0xed   : > { %v618_v32 = vpop.f32.mrb[1].mxu1 }
  0xee   : > { %v334_v33 = vpop.f32.mrb[2].mxu1 }
  0xef   : > { %v619_v34 = vpop.f32.mrb[3].mxu1 }
  0xf9   : > { %v480_v35 = vpop.f32.mrb[0].mxu0 }
  0xfa   : > { %v644_v37 = vadd.f32 %v480_v35, %v331_v31  ;;  %v642_v38 = vpop.f32.mrb[1].mxu0 }
  0xfb   : > { %v483_v40 = vpop.f32.mrb[2].mxu0 }
  0xfc   : > { %v494_v41 = vmul.f32 %v644_v37, %v587_v36  ;;  %v645_v42 = vadd.f32 %v483_v40, %v334_v33  ;;  %v643_v43 = vpop.f32.mrb[3].mxu0 }
  0xfe   : > { %v501_v44 = vadd.f32 %v588_v39, %v494_v41  ;;  %v495_v45 = vmul.f32 %v645_v42, %v587_v36 }
 0x100   : > { %v503_v46 = vmax.f32 %v501_v44, 0.0  ;;  %v502_v47 = vadd.f32 %v588_v39, %v495_v45 }
 0x102   : > { %505 = vst [vmem:[%s224_s7] sm:$0xff] %v503_v46  ;;  %v504_v48 = vmax.f32 %v502_v47, 0.0 }
 0x104   : > { %506 = vst [vmem:[%s224_s7 + $0x8] sm:$0xff] %v504_v48 }
 0x105 PF: > { %s15_s18 = sadd.s32 1, %s680_s18  }
 0x106   : > { %p12_p4 = scmp.ge.s32.totalorder %s15_s18, 4  }
 0x108   :  { %14 = sbr.rel (!%p12_p4) target bundleno = 1 (0x1), region = 70 }

</bundles_post_ra>
